<compile_context>
chip_gen: v7x
topology: tpu7x:2x2x1
jax: 0.10.0
libtpu: 0.0.40
codegen_flags: <defaults>
</compile_context>

<pallas_src>
import functools
import math

import jax
import jax.numpy as jnp
from jax.experimental import pallas as pl
from jax.experimental.pallas import tpu as pltpu


def _mhsa_kernel(x_ref, w_ref, b_ref, o_ref, *, n_heads, head_dim):
    # x_ref : (1, S, D)   current batch element
    # w_ref : (D, 3*D)    packed [Wq | Wk | Wv] columns (resident across grid)
    # b_ref : (1, 3*D)    packed [bq | bk | bv]
    # o_ref : (1, S, D)   lane-dense output slab for this batch element
    S = x_ref.shape[1]
    D = x_ref.shape[2]
    H, hd = n_heads, head_dim

    x = x_ref[0]                                   # (S, D)
    w = w_ref[...]                                 # (D, 3D)
    b = b_ref[...]                                 # (1, 3D)

    # Fused Q/K/V projection for ALL heads: a single wide MXU pass (N = 3D)
    # with f32 accumulation.
    qkv = jnp.dot(x, w, preferred_element_type=jnp.float32) + b   # (S, 3D)

    scale = 1.0 / math.sqrt(hd)
    q = qkv[:, :D] * scale                         # scale folded into Q once
    k = qkv[:, D:2 * D]
    v = qkv[:, 2 * D:3 * D]

    # Head-major layout (H, S, hd) for batched per-head matmuls.
    qh = q.reshape(S, H, hd).transpose(1, 0, 2)
    kh = k.reshape(S, H, hd).transpose(1, 0, 2)
    vh = v.reshape(S, H, hd).transpose(1, 0, 2)

    # Per-head scores (H, S, S): contract over head_dim on the last axis of
    # both operands (no explicit transpose of K).
    s = jnp.einsum("hqd,hkd->hqk", qh, kh, preferred_element_type=jnp.float32)

    # Numerically-stable softmax; normalization deferred to the smaller
    # (H, S, hd) output tile, using an exact reciprocal (bit-closer parity
    # with the PyTorch reference — approx EUP recip not needed here).
    s = s - jnp.max(s, axis=-1, keepdims=True)
    p = jnp.exp(s)                                 # unnormalized probs (H, S, S)
    l = jnp.sum(p, axis=-1, keepdims=True)         # row sums (H, S, 1)

    o = jnp.einsum("hqk,hkd->hqd", p, vh, preferred_element_type=jnp.float32)
    o = o * pl.reciprocal(l, approx=False)         # (H, S, hd)

    # (H, S, hd) -> (S, D): identical to torch's permute(0,2,1,3).view, done
    # in-kernel so the store is a single full-width slab and no wrapper
    # transpose / extra HBM round trip is needed.
    o_ref[0] = o.transpose(1, 0, 2).reshape(S, D).astype(o_ref.dtype)


def pack_qkv_params(wq, wk, wv, bq, bk, bv):
    """Pre-pack the projection params once (init-time, not in the hot path).

    Weights are stored (in, out) so the projection is x @ W + b (equals
    torch's x @ W_torch.T + b).
    """
    wqkv = jnp.concatenate([wq, wk, wv], axis=1)            # (D, 3D)
    bqkv = jnp.concatenate([bq, bk, bv], axis=0)[None, :]   # (1, 3D)
    return wqkv, bqkv


def multi_head_self_attention(x, wqkv, bqkv, *, n_heads):
    """x: (B, S, D); wqkv: (D, 3D) packed [Wq|Wk|Wv]; bqkv: (1, 3D)."""
    B, S, D = x.shape
    hd = D // n_heads

    kernel = functools.partial(_mhsa_kernel, n_heads=n_heads, head_dim=hd)

    return pl.pallas_call(
        kernel,
        out_shape=jax.ShapeDtypeStruct((B, S, D), x.dtype),
        grid_spec=pltpu.PrefetchScalarGridSpec(
            num_scalar_prefetch=0,
            grid=(B,),
            in_specs=[
                pl.BlockSpec((1, S, D), lambda b: (b, 0, 0)),
                # Constant block index across the grid -> the packed QKV slab
                # is DMA'd once and stays resident (no per-batch re-fetch).
                pl.BlockSpec((D, 3 * D), lambda b: (0, 0)),
                pl.BlockSpec((1, 3 * D), lambda b: (0, 0)),
            ],
            out_specs=pl.BlockSpec((1, S, D), lambda b: (b, 0, 0)),
        ),
        compiler_params=pltpu.CompilerParams(
            dimension_semantics=("parallel",)),
    )(x, wqkv, bqkv)


def _reference(x, wq, wk, wv, bq, bk, bv, n_heads):
    """Pure-JAX mirror of the PyTorch forward pass."""
    B, S, D = x.shape
    hd = D // n_heads
    q = x @ wq + bq
    k = x @ wk + bk
    v = x @ wv + bv
    q = q.reshape(B, S, n_heads, hd).transpose(0, 2, 1, 3)
    k = k.reshape(B, S, n_heads, hd).transpose(0, 2, 1, 3)
    v = v.reshape(B, S, n_heads, hd).transpose(0, 2, 1, 3)
    scores = jnp.einsum("bhqd,bhkd->bhqk", q, k) / math.sqrt(hd)
    probs = jax.nn.softmax(scores, axis=-1)
    out = jnp.einsum("bhqk,bhkd->bhqd", probs, v)
    return out.transpose(0, 2, 1, 3).reshape(B, S, D)


if __name__ == "__main__":
    B, S, D, H = 2, 8, 32, 4

    key = jax.random.PRNGKey(0)
    kx, kq, kk, kv, kbq, kbk, kbv = jax.random.split(key, 7)

    x = jax.random.normal(kx, (B, S, D), dtype=jnp.float32)

    scale = 1.0 / math.sqrt(D)
    wq = jax.random.uniform(kq, (D, D), jnp.float32, -scale, scale)
    wk = jax.random.uniform(kk, (D, D), jnp.float32, -scale, scale)
    wv = jax.random.uniform(kv, (D, D), jnp.float32, -scale, scale)
    bq = jax.random.uniform(kbq, (D,), jnp.float32, -scale, scale)
    bk = jax.random.uniform(kbk, (D,), jnp.float32, -scale, scale)
    bv = jax.random.uniform(kbv, (D,), jnp.float32, -scale, scale)

    # Pack once at "init" time (kept out of the per-call hot path).
    wqkv, bqkv = pack_qkv_params(wq, wk, wv, bq, bk, bv)

    out = multi_head_self_attention(x, wqkv, bqkv, n_heads=H)
    out = jax.block_until_ready(out)

    ref = _reference(x, wq, wk, wv, bq, bk, bv, H)
    assert out.shape == (B, S, D)
    # Exact f32 math everywhere (exact reciprocal in the softmax), so only
    # accumulation-order noise remains.
    assert jnp.allclose(out, ref, atol=1e-4, rtol=1e-4), (
        f"max abs err {jnp.max(jnp.abs(out - ref))}")

    print("KERNEL_OK")
</pallas_src>

<mosaic_0001>
module attributes {stable_mosaic.version = 11 : i64} {
  func.func @_mhsa_kernel(%arg0: i32, %arg1: memref<1x8x32xf32, #tpu.memory_space<vmem>>, %arg2: memref<32x96xf32, #tpu.memory_space<vmem>>, %arg3: memref<1x96xf32, #tpu.memory_space<vmem>>, %arg4: memref<1x8x32xf32, #tpu.memory_space<vmem>>) attributes {dimension_semantics = [#tpu.dimension_semantics<parallel>], iteration_bounds = array<i64: 2>, scalar_prefetch = 0 : i64, scratch_operands = 0 : i64, tpu.core_type = #tpu.core_type<tc>, window_params = [{transform_indices = @transform_0, window_bounds = array<i64: 1, 8, 32>}, {pipeline_mode = #tpu.pipeline_mode<synchronous>, transform_indices = @transform_1, window_bounds = array<i64: 32, 96>}, {pipeline_mode = #tpu.pipeline_mode<synchronous>, transform_indices = @transform_2, window_bounds = array<i64: 1, 96>}, {transform_indices = @transform_3, window_bounds = array<i64: 1, 8, 32>}]} {
    %c0 = arith.constant 0 : index
    %c0_0 = arith.constant 0 : index
    %c0_1 = arith.constant 0 : index
    %0 = vector.load %arg1[%c0, %c0_0, %c0_1] : memref<1x8x32xf32, #tpu.memory_space<vmem>>, vector<1x8x32xf32>
    %1 = vector.shape_cast %0 : vector<1x8x32xf32> to vector<8x32xf32>
    %c0_2 = arith.constant 0 : index
    %c0_3 = arith.constant 0 : index
    %2 = vector.load %arg2[%c0_2, %c0_3] : memref<32x96xf32, #tpu.memory_space<vmem>>, vector<32x96xf32>
    %c0_4 = arith.constant 0 : index
    %c0_5 = arith.constant 0 : index
    %3 = vector.load %arg3[%c0_4, %c0_5] : memref<1x96xf32, #tpu.memory_space<vmem>>, vector<1x96xf32>
    %cst = arith.constant dense<0.000000e+00> : vector<8x96xf32>
    %4 = tpu.matmul %1, %2, %cst {dimension_numbers = #tpu.dot_dimension_numbers<[1], [0], [0], [1], [0, 0, 1, 1], [], []>} : vector<8x32xf32>, vector<32x96xf32>, vector<8x96xf32> -> vector<8x96xf32>
    %5 = vector.broadcast %3 : vector<1x96xf32> to vector<8x96xf32>
    %6 = arith.addf %4, %5 : vector<8x96xf32>
    %7 = vector.extract_strided_slice %6 {offsets = [0, 0], sizes = [8, 32], strides = [1, 1]} : vector<8x96xf32> to vector<8x32xf32>
    %cst_6 = arith.constant 0.353553385 : f32
    %8 = vector.broadcast %cst_6 : f32 to vector<8x32xf32>
    %9 = arith.mulf %7, %8 : vector<8x32xf32>
    %10 = vector.extract_strided_slice %6 {offsets = [0, 32], sizes = [8, 32], strides = [1, 1]} : vector<8x96xf32> to vector<8x32xf32>
    %11 = vector.extract_strided_slice %6 {offsets = [0, 64], sizes = [8, 32], strides = [1, 1]} : vector<8x96xf32> to vector<8x32xf32>
    %12 = vector.shape_cast %9 : vector<8x32xf32> to vector<8x4x8xf32>
    %13 = tpu.transpose %12, [1, 0, 2] : vector<8x4x8xf32> -> vector<4x8x8xf32>
    %14 = vector.shape_cast %10 : vector<8x32xf32> to vector<8x4x8xf32>
    %15 = tpu.transpose %14, [1, 0, 2] : vector<8x4x8xf32> -> vector<4x8x8xf32>
    %16 = vector.shape_cast %11 : vector<8x32xf32> to vector<8x4x8xf32>
    %17 = tpu.transpose %16, [1, 0, 2] : vector<8x4x8xf32> -> vector<4x8x8xf32>
    "tpu.trace_start"() <{level = 10 : i32, message = "hqd,hkd->hqk"}> : () -> ()
    %cst_7 = arith.constant dense<0.000000e+00> : vector<4x8x8xf32>
    %18 = tpu.matmul %13, %15, %cst_7 {dimension_numbers = #tpu.dot_dimension_numbers<[2], [2], [1], [1], [0, 0, 0, 1, 1, 1], [0], [0]>} : vector<4x8x8xf32>, vector<4x8x8xf32>, vector<4x8x8xf32> -> vector<4x8x8xf32>
    "tpu.trace_stop"() : () -> ()
    %cst_8 = arith.constant dense<0xFF800000> : vector<4x8xf32>
    %19 = vector.multi_reduction <maximumf>, %18, %cst_8 [2] : vector<4x8x8xf32> to vector<4x8xf32>
    %20 = vector.shape_cast %19 : vector<4x8xf32> to vector<4x8x1xf32>
    %21 = vector.broadcast %20 : vector<4x8x1xf32> to vector<4x8x8xf32>
    %22 = arith.subf %18, %21 : vector<4x8x8xf32>
    %23 = math.exp %22 : vector<4x8x8xf32>
    %cst_9 = arith.constant dense<0.000000e+00> : vector<4x8xf32>
    %24 = vector.multi_reduction <add>, %23, %cst_9 [2] : vector<4x8x8xf32> to vector<4x8xf32>
    %25 = vector.shape_cast %24 : vector<4x8xf32> to vector<4x8x1xf32>
    "tpu.trace_start"() <{level = 10 : i32, message = "hqk,hkd->hqd"}> : () -> ()
    %cst_10 = arith.constant dense<0.000000e+00> : vector<4x8x8xf32>
    %26 = tpu.matmul %23, %17, %cst_10 {dimension_numbers = #tpu.dot_dimension_numbers<[2], [1], [1], [2], [0, 0, 0, 1, 1, 2], [0], [0]>} : vector<4x8x8xf32>, vector<4x8x8xf32>, vector<4x8x8xf32> -> vector<4x8x8xf32>
    "tpu.trace_stop"() : () -> ()
    %27 = tpu.reciprocal %25 : vector<4x8x1xf32> -> vector<4x8x1xf32>
    %28 = vector.broadcast %27 : vector<4x8x1xf32> to vector<4x8x8xf32>
    %29 = arith.mulf %26, %28 : vector<4x8x8xf32>
    %30 = tpu.transpose %29, [1, 0, 2] : vector<4x8x8xf32> -> vector<8x4x8xf32>
    %31 = vector.shape_cast %30 : vector<8x4x8xf32> to vector<8x32xf32>
    %c0_11 = arith.constant 0 : index
    %c0_12 = arith.constant 0 : index
    %c0_13 = arith.constant 0 : index
    %32 = vector.load %arg4[%c0_11, %c0_12, %c0_13] : memref<1x8x32xf32, #tpu.memory_space<vmem>>, vector<1x8x32xf32>
    %33 = vector.shape_cast %32 : vector<1x8x32xf32> to vector<8x32xf32>
    %34 = vector.shape_cast %31 : vector<8x32xf32> to vector<1x8x32xf32>
    tpu.vector_store %arg4[%c0_11, %c0_12, %c0_13], %34 {strides = array<i32>} : memref<1x8x32xf32, #tpu.memory_space<vmem>>, vector<1x8x32xf32>,
    return
  }
  func.func @transform_0(%arg0: i32) -> (i32, i32, i32) {
    %c0_i32 = arith.constant 0 : i32
    %c0_i32_0 = arith.constant 0 : i32
    %c0_i32_1 = arith.constant 0 : i32
    return %arg0, %c0_i32, %c0_i32_0 : i32, i32, i32
  }
  func.func @transform_1(%arg0: i32) -> (i32, i32) {
    %c0_i32 = arith.constant 0 : i32
    %c0_i32_0 = arith.constant 0 : i32
    %c0_i32_1 = arith.constant 0 : i32
    return %c0_i32, %c0_i32_0 : i32, i32
  }
  func.func @transform_2(%arg0: i32) -> (i32, i32) {
    %c0_i32 = arith.constant 0 : i32
    %c0_i32_0 = arith.constant 0 : i32
    %c0_i32_1 = arith.constant 0 : i32
    return %c0_i32, %c0_i32_0 : i32, i32
  }
  func.func @transform_3(%arg0: i32) -> (i32, i32, i32) {
    %c0_i32 = arith.constant 0 : i32
    %c0_i32_0 = arith.constant 0 : i32
    %c0_i32_1 = arith.constant 0 : i32
    return %arg0, %c0_i32, %c0_i32_0 : i32, i32, i32
  }
}

</mosaic_0001>

<bundles_post_ra>
// kernel: tpu_custom_call.1
= control target key start
LH: loop header
LB: loop body
LE: loop exit
PB: predicated region body
PF: predicated region fallthrough
CT: control target
= control target key end

     0   :  { %8 = vsyncpa [#allocation3], 0  ;;  %s2332_s0 = inlined_call_operand.hbm [shape: f32[2,8,32], index: 0, kind: input, shape index: {}]   ;;  %s2333_s1 = inlined_call_operand.hbm [shape: f32[32,96], index: 1, kind: input, shape index: {}]   ;;  %s2334_s2 = inlined_call_operand.vmem [shape: f32[1,96], index: 2, kind: input, shape index: {}]   ;;  %s2335_s3 = inlined_call_operand.hbm [shape: f32[2,8,32], index: 3, kind: output, shape index: {}]  }
   0x1   :  { %10 = vsyncpa [#allocation3 + $0x1], 0 }
   0x2   :  { %11 = vsyncpa [#allocation6], 0 }
   0x3   :  { %12 = vsyncpa [#allocation4], 0 }
   0x4   :  { %14 = vsyncpa [#allocation4 + $0x1], 0  ;;  %s1996_s12 = smov 0   ;;  %s1998_s13 = smov 0  }
   0x5   :  { %s2000_s14 = smov 0   ;;  %s2002_s15 = smov 0  }
   0x6 LB: > { %s2017_s16 = sadd.s32 4294967295, %s1956_s15   ;;  %s1626_s17 = sadd.s32 4294967294, %s1956_s15   ;;  %s1956_s15 = sphi %s2002_s15, %s2355_s15   ;;  %s1952_s14 = sphi %s2000_s14, %s2354_s14   ;;  %s1948_s13 = sphi %s1998_s13, %s2353_s13   ;;  %s1944_s12 = sphi %s1996_s12, %s2352_s12  }
   0x7   : > { %p40_p0 = scmp.ne.s32.totalorder %s1948_s13, %s1944_s12  ;;  %p2336_p1 = scmp.eq.s32.totalorder %s2017_s16, 0 }
   0x8   : > { %p112_p3 = scmp.eq.s32.totalorder %s1626_s17, 1  ;;  %p1627_p5 = scmp.ge.s32.totalorder %s1956_s15, 1 }
   0x9   : > { %p2026_p4 = por %p2336_p1, %p40_p0  ;;  %p119_p7 = scmp.lt.s32.totalorder %s1956_s15, 3 }
   0xa   : > { %p2031_p6 = por %p112_p3, %p40_p0  ;;  %s1958_s21 = smov [#allocation5]  }
   0xb   : > { %s2339_s18 = scalar_select %p2026_p4, 1, 0 }
   0xc   : > { %s2340_s19 = scalar_select %p2031_p6, 1, 0 }
   0xd   : > { %p2036_p8 = pnand %p1627_p5, %p119_p7  ;;  %s131_s22 = sshll.u32 %s1958_s21, 4  ;;  %s2040_s22 = int_to_ptr.vmem [resolvable:$true] %s131_s22 }
   0xe   : > { %s2052_s24 = sadd.s32 1, %s1956_s15   ;;  %s27_s25 = sadd.s32 1, %s1952_s14 }
   0xf   : > { %s2341_s20 = scalar_select %p2036_p8, 1, 0 }
  0x10   : > { %p1748_p9 = pneg %p2036_p8  ;;  %s24_s26 = ssub.s32 %s1956_s15, %s2052_s24 }
  0x11   : > { %s1828_s29 = scalar_lea.hbm %s2333_s1, 512 }
  0x12   : > { %p2047_p11 = pnand %p1748_p9, %p2336_p1  ;;  %p1829_p12 = scmp.ne.s32.totalorder %s2333_s1, %s1828_s29 }
  0x13   : > { %p1835_p5 = scmp.lt.u32.totalorder %s1828_s29, %s2333_s1 }
  0x14   : > { %p1830_p13 = pneg %p2047_p11 }
  0x16   : > { %p1831_p0 = pnand %p1830_p13, %p1829_p12 }
  0x18   : > { %p1832_p3 = pneg %p1831_p0 }
  0x1a   : > { %p1837_p7 = pnand %p1835_p5, %p1832_p3 }
  0x1c   : > { %1840 = shalt.err (!%p1837_p7)
}
  0x1d   : > { %s1841_s7 = scalar_lea.vmem %s2040_s22, 512  ;;  %p1849_p2 = scmp.lt.s32.totalorder %s2040_s22, %s2040_s22 }
  0x1e   : > { %p1842_p9 = scmp.ne.s32.totalorder %s2040_s22, %s1841_s7  ;;  %p1850_p6 = scmp.lt.s32.totalorder %s1841_s7, %s1841_s7 }
  0x20   : > { %p1844_p10 = pnand %p1842_p9, %p1830_p13  ;;  %p1851_p4 = por %p1850_p6, %p1849_p2 }
  0x22   : > { %p1845_p1 = pneg %p1844_p10 }
  0x24   : > { %p1852_p8 = pnand %p1851_p4, %p1845_p1 }
  0x26   : > { %1855 = shalt.err (!%p1852_p8)
}
  0x27   : > { %s1959_s8 = smov 128   ;;  %s1960_s9 = smov 8  }
  0x28   : > { %1751 = dma.hbm_to_vmem [thread:$0]  (!%p2047_p11), %s2333_s1, 512, %s2040_s22, [#allocation6], %s1959_s8, %s1959_s8, %s1960_s9  }
  0x29   : > { %p25_p2 = scmp.eq.s32.totalorder %s24_s26, 0  ;;  %p34_p1 = scmp.ne.s32.totalorder %s1952_s14, %s1948_s13 }
  0x2a   : > { %p35_p4 = scmp.eq.s32.totalorder %s1956_s15, 0  ;;  %p1761_p6 = scmp.lt.s32.totalorder %s1956_s15, 2 }
  0x2b   : > { %s2083_s17 = scalar_select %p25_p2, %s1952_s14, %s27_s25  }
  0x2c   : > { %p36_p8 = por %p35_p4, %p34_p1  ;;  %p2343_p10 = scmp.eq.s32.totalorder %s2017_s16, 1 }
  0x2d   : > { %s148_s27 = sand.u32 1, %s1952_s14   ;;  %s1631_s28 = sshll.u32 %s1956_s15, 7 }
  0x2e   : > { %p2087_p12 = por %p2343_p10, %p34_p1  ;;  %s1630_s29 = sshll.u32 %s148_s27, 3 }
  0x2f   : > { %s2096_s4 = scalar_lea.hbm %s2332_s0, %s1631_s28  ;;  %s152_s22 = scalar_lea.vmem [#allocation2], %s1630_s29 }
  0x30   : > { %s159_s25 = sshll.u32 %s152_s22, 4  ;;  %p2098_p11 = pnand %p1761_p6, %p36_p8  ;;  %s2102_s25 = int_to_ptr.vmem [resolvable:$true] %s159_s25 }
  0x31   : > { %s149_s5 = scalar_lea.sflag [#allocation3], %s148_s27  ;;  %s1856_s6 = scalar_lea.hbm %s2096_s4, 128 }
  0x32   : > { %p1857_p13 = scmp.ne.s32.totalorder %s2096_s4, %s1856_s6  ;;  %p1858_p0 = pneg %p2098_p11 }
  0x33   : > { %s1861_s9 = scalar_lea.hbm %s2332_s0, 256  ;;  %p1862_p7 = scmp.lt.u32.totalorder %s2096_s4, %s2332_s0 }
  0x34   : > { %p1859_p3 = pnand %p1858_p0, %p1857_p13  ;;  %p1863_p9 = scmp.lt.u32.totalorder %s1861_s9, %s1856_s6 }
  0x35   : > { %p1865_p1 = scmp.lt.u32.totalorder %s1856_s6, %s2096_s4 }
  0x36   : > { %p1860_p5 = pneg %p1859_p3  ;;  %p1864_p2 = por %p1863_p9, %p1862_p7 }
  0x38   : > { %p1866_p4 = por %p1865_p1, %p1864_p2 }
  0x3a   : > { %p1867_p6 = pnand %p1866_p4, %p1860_p5 }
  0x3c   : > { %1870 = shalt.err (!%p1867_p6)
}
  0x3d   : > { %s1871_s27 = scalar_lea.vmem %s2102_s25, 128  ;;  %s1961_s28 = smov [#allocation2]  }
  0x3e   : > { %p1872_p8 = scmp.ne.s32.totalorder %s2102_s25, %s1871_s27  ;;  %s1876_s29 = sshll.u32 %s1961_s28, 4  ;;  %s1877_s29 = int_to_ptr.vmem [resolvable:$false] %s1876_s29 }
  0x3f   : > { %s1878_s23 = scalar_lea.vmem %s1877_s29, 256  ;;  %p1879_p3 = scmp.lt.s32.totalorder %s2102_s25, %s1877_s29 }
  0x40   : > { %p1874_p10 = pnand %p1872_p8, %p1858_p0  ;;  %p1880_p7 = scmp.lt.s32.totalorder %s1878_s23, %s1871_s27 }
  0x42   : > { %p1875_p13 = pneg %p1874_p10  ;;  %p1881_p9 = por %p1880_p7, %p1879_p3 }
  0x44   : > { %p1882_p2 = pnand %p1881_p9, %p1875_p13 }
  0x46   : > { %1885 = shalt.err (!%p1882_p2)
}
  0x47   : > { %1755 = dma.hbm_to_vmem [thread:$0]  (!%p2098_p11), %s2096_s4, 128, %s2102_s25, %s149_s5  }
  0x48   : > { %p2346_p5 = scmp.ne.s32.totalorder %s2341_s20, 0 }
  0x49   : > { %s2132_s30 = sand.u32 (!%p2346_p5), 1, %s1948_s13   ;;  %p2347_p0 = scmp.ne.s32.totalorder (!%p2346_p5), %s2339_s18, 0 }
  0x4a   : > { %168 = sbr.rel (%p2346_p5) target bundleno = 1322 (0x52a), region = 32  ;;  %s1633_s22 = sshll.u32 (!%p2346_p5), %s2132_s30, 3 }
  0x4b   : > { %s171_s6 = scalar_lea.sflag (!%p2346_p5), [#allocation3], %s2132_s30  ;;  %s174_s7 = scalar_lea.vmem (!%p2346_p5), [#allocation2], %s1633_s22 }
  0x51   : > { %1931 = dma.done.wait (%p2347_p0), %s171_s6, 128  }
  0x52   : > { %1933 = vsyncadd (%p2347_p0), %s171_s6, 4294967168  ;;  %p2348_p11 = scmp.eq.s32.totalorder %s2017_s16, 0 }
  0x54   : > { %1935 = dma.done.wait (%p2348_p11), [#allocation6], 512   ;;  %p2349_p1 = pmov %p2348_p11 }
  0x55   : > { %v1962_v0 = vmov 0.0|0.0   ;;  %vm1963_vm0 = vmmov 0   ;;  %v1964_v1 = vmov 0.0   ;;  %v202_v2 = vld [vmem:[#allocation5] sm:$0xff]  ;;  %v203_v3 = vld [vmem:[#allocation5 + $0x8] sm:$0xff]  ;;  %v204_v4 = vld [vmem:[#allocation5 + $0x10] sm:$0xff]  ;;  %v303_v20 = vlaneseq }
  0x56   : > { %1937 = vsyncadd (%p2349_p1), [#allocation6], 4294966784  ;;  %1734 = vmatprep.subr.bf16.mxu0 %v1962_v0  ;;  %1691 = vmatprep.mubr.msk.f32.mxu0 %vm1963_vm0, %v1964_v1  ;;  %v1735_v5 = vpack.c.bf16 %v203_v3, %v202_v2  ;;  %v205_v6 = vld [vmem:[#allocation5 + $0x18] sm:$0xff]  ;;  %vm213_vm1 = vcmask 261120   ;;  %v1636_v9 = vld [vmem:[%s2334_s2] ss:$0 sm:$0xff] }
  0x57   : > { %1694 = vmatprep.subr.mxu1 %v1964_v1  ;;  %1696 = vmatprep.mubr.msk.f32.mxu1 %vm1963_vm0, %v1964_v1  ;;  %v1738_v7 = vpack.c.bf16 %v205_v6, %v204_v4  ;;  %v201_v8 = vld [vmem:[%s174_s7] sm:$0xff]  ;;  %s1965_s4 = smov 104   ;;  %s1966_s25 = smov 120   ;;  %v1970_v18 = vmov 1983009808   ;;  %v304_v24 = vshrl.u32 %v303_v20, 7 }
  0x58   : > { %1736 = vmatpush3.bf16.msra.mxu0 %v1735_v5  ;;  %s1967_s26 = smov 96   ;;  %s1968_s5 = smov 112   ;;  %v301_v19 = vunpack.c.l.s4 %v1970_v18  ;;  %v1971_v21 = vmov 1934713408   ;;  %vm737_vm2 = vcmask 64512   ;;  %vm1527_vm3 = vcmask 130048  }
  0x59   : > { %1737 = vmatprep.subr.bf16.mxu0 %v1962_v0  ;;  %s1969_s8 = smov 64   ;;  %v333_v22 = vunpack.c.l.s4 %v1971_v21  ;;  %s1972_s9 = smov 16   ;;  %vm1529_vm4 = vcmask 195584  }
  0x5a   : > { %v302_v23 = vunpack.c.0.s8 %v301_v19  ;;  %s1973_s10 = smov 8   ;;  %s1974_s11 = smov 24  }
  0x5b   : > { %v334_v27 = vunpack.c.0.s8 %v333_v22  ;;  %s1659_s27 = sshll.u32 %s2017_s16, 7  ;;  %s200_s28 = scalar_lea.vmem [#allocation7], %s1633_s22 }
  0x5c   : > { %1739 = vmatpush3.bf16.msra.mxu0 %v1738_v7  ;;  %v2168_v28 = vsub.s32 %v302_v23, %v304_v24  ;;  %s1546_s29 = sshll.u32 %s200_s28, 4  ;;  %s2287_s7 = scalar_lea.hbm %s2335_s3, %s1659_s27  ;;  %s2289_s29 = int_to_ptr.vmem [resolvable:$true] %s1546_s29 }
  0x5d   : > { %1704 = vmatprep.subr.mxu0 %v1964_v1  ;;  %v2170_v35 = vsub.s32 %v334_v27, %v304_v24  ;;  %s1533_s16 = scalar_lea.sflag [#allocation4], %s2132_s30  ;;  %s1886_s18 = scalar_lea.vmem %s2289_s29, 128 }
  0x5e   : > { %p1887_p4 = scmp.ne.s32.totalorder %s2289_s29, %s1886_s18  ;;  %s1975_s22 = smov [#allocation7]  }
  0x5f   : > { %1692 = vmatmul.mubr.msk.f32.vlgmr.msra.gmra.mrb[0].mxu0 %vm213_vm1, %v201_v8  ;;  %s1890_s20 = sshll.u32 %s1975_s22, 4  ;;  %s1891_s20 = int_to_ptr.vmem [resolvable:$false] %s1890_s20 }
  0x60   : > { %1706 = vmatprep.mubr.msk.f32.mxu0 %vm1963_vm0, %v1964_v1  ;;  %p1888_p6 = pnand %p1887_p4, %p2087_p12  ;;  %p1893_p10 = scmp.lt.s32.totalorder %s2289_s29, %s1891_s20 }
  0x62   : > { %p1889_p8 = pneg %p1888_p6 }
 0x132   : > { %v283_v10 = vpop.f32.mrb[0].mxu0 }
 0x133   : > { %v284_v11 = vadd.f32 %v1636_v9, %v283_v10  ;;  %v1693_v12 = vpop.f32.mrb[1].mxu0 }
 0x135   : > { %439 = vrot.lane.b32.xlu1 %v284_v11, %s1965_s4  ;;  %435 = vrot.lane.b32.xlu0 %v284_v11, %s1966_s25  ;;  %v287_v13 = vmul.f32 0.35355338, %v284_v11 }
 0x139   : > { %441 = vrot.lane.b32.xlu1 %v284_v11, %s1967_s26  ;;  %437 = vrot.lane.b32.xlu0 %v284_v11, %s1968_s5 }
 0x13d   : > { %289 = vrot.lane.b32.xlu1 %v287_v13, %s1966_s25 }
 0x1a7   : > { %v2158_v14 = vpop.permute.xlu0 %435  ;;  %v2161_v15 = vpop.permute.xlu1 %439 }
 0x1a8   : > { %443 = vrot.lane.b32.xlu0 %v2158_v14, %s1967_s26 }
 0x1ab   : > { %v2163_v16 = vpop.permute.xlu0 %437  ;;  %v442_v17 = vpop.permute.xlu1 %441 }
 0x1ac   : > { %447 = vrot.lane.b32.xlu0 %v2161_v15, %s1967_s26  ;;  %445 = vrot.lane.b32.xlu1 %v2163_v16, %s1967_s26 }
 0x1af   : > { %v290_v25 = vpop.permute.xlu1 %289 }
 0x1b0   : > { %292 = vrot.lane.b32.xlu0 %v287_v13, %s1968_s5  ;;  %295 = vrot.lane.b32.xlu1 %v287_v13, %s1965_s4  ;;  %s1892_s4 = scalar_lea.vmem %s1891_s20, 256 }
 0x1b1   : > { %p1894_p13 = scmp.lt.s32.totalorder %s1892_s4, %s1886_s18 }
 0x1b3   : > { %p1895_p3 = por %p1894_p13, %p1893_p10 }
 0x1b4   : > { %589 = vrot.lane.b32.xlu1 %v284_v11, %s1969_s8 }
 0x1b5   : > { %p1896_p7 = pnand %p1895_p3, %p1889_p8 }
 0x21a   : > { %v444_v26 = vpop.permute.xlu0 %443 }
 0x21e   : > { %v448_v29 = vpop.permute.xlu0 %447  ;;  %v446_v30 = vpop.permute.xlu1 %445 }
 0x21f   : > { %v469_v31 = vcombine.low %v444_v26, %v448_v29  ;;  %v470_v32 = vcombine.high %v444_v26, %v448_v29  ;;  %v453_v33 = vcombine.low %v442_v17, %v446_v30  ;;  %v454_v34 = vcombine.high %v442_v17, %v446_v30 }
 0x221   : > { %v477_v36 = vrot.slane %v469_v31, %v2168_v28  ;;  %v484_v37 = vrot.slane %v470_v32, %v2168_v28  ;;  %v461_v38 = vrot.slane %v453_v33, %v2168_v28  ;;  %v468_v39 = vrot.slane %v454_v34, %v2168_v28 }
 0x222   : > { %v293_v40 = vpop.permute.xlu0 %292  ;;  %v296_v41 = vpop.permute.xlu1 %295 }
 0x223   : > { %v485_v42 = vcombine.low %v461_v38, %v477_v36  ;;  %v486_v43 = vcombine.high %v461_v38, %v477_v36  ;;  %v501_v44 = vcombine.low %v468_v39, %v484_v37  ;;  %v502_v45 = vcombine.high %v468_v39, %v484_v37 }
 0x224   : > { %v298_v46 = vcombine.low %v287_v13, %v293_v40  ;;  %v299_v47 = vcombine.high %v287_v13, %v293_v40  ;;  %v314_v48 = vcombine.low %v290_v25, %v296_v41  ;;  %v315_v49 = vcombine.high %v290_v25, %v296_v41 }
 0x225   : > { %v493_v50 = vrot.slane %v485_v42, %v2170_v35  ;;  %v500_v51 = vrot.slane %v486_v43, %v2170_v35  ;;  %v509_v52 = vrot.slane %v501_v44, %v2170_v35  ;;  %v516_v53 = vrot.slane %v502_v45, %v2170_v35 }
 0x226   : > { %v306_v54 = vrot.slane %v298_v46, %v2168_v28  ;;  %v313_v55 = vrot.slane %v299_v47, %v2168_v28  ;;  %v322_v56 = vrot.slane %v314_v48, %v2168_v28  ;;  %v329_v57 = vrot.slane %v315_v49, %v2168_v28 }
 0x227   : > { %v521_v58 = vcombine.low %v493_v50, %v500_v51  ;;  %v1640_v59 = vcombine.high %v493_v50, %v500_v51  ;;  %v537_v60 = vcombine.low %v509_v52, %v516_v53  ;;  %v1641_v61 = vcombine.high %v509_v52, %v516_v53 }
 0x228   : > { %v330_v62 = vcombine.low %v306_v54, %v322_v56  ;;  %v331_v63 = vcombine.high %v306_v54, %v322_v56  ;;  %v346_v0 = vcombine.low %v313_v55, %v329_v57  ;;  %v347_v2 = vcombine.high %v313_v55, %v329_v57 }
 0x229   : > { %v528_v3 = vrot.slane %v521_v58, %v2168_v28  ;;  %v536_v4 = vrot.slane %v1640_v59, %v2168_v28  ;;  %v544_v5 = vrot.slane %v537_v60, %v2168_v28  ;;  %v552_v6 = vrot.slane %v1641_v61, %v2168_v28  ;;  %v590_v60 = vpop.permute.xlu1 %589 }
 0x22a   : > { %v338_v7 = vrot.slane %v330_v62, %v2170_v35  ;;  %v345_v8 = vrot.slane %v331_v63, %v2170_v35  ;;  %v354_v9 = vrot.slane %v346_v0, %v2170_v35  ;;  %v361_v10 = vrot.slane %v347_v2, %v2170_v35 }
 0x22b   : > { %v553_v11 = vcombine.low %v528_v3, %v536_v4  ;;  %v554_v12 = vcombine.high %v528_v3, %v536_v4  ;;  %v569_v13 = vcombine.low %v544_v5, %v552_v6  ;;  %v570_v17 = vcombine.high %v544_v5, %v552_v6 }
 0x22c   : > { %v366_v18 = vcombine.low %v338_v7, %v345_v8  ;;  %v1638_v19 = vcombine.high %v338_v7, %v345_v8  ;;  %v382_v20 = vcombine.low %v354_v9, %v361_v10  ;;  %v1639_v21 = vcombine.high %v354_v9, %v361_v10 }
 0x22d   : > { %v561_v22 = vrot.slane %v553_v11, %v2170_v35  ;;  %v577_v23 = vrot.slane %v569_v13, %v2170_v35  ;;  %v568_v24 = vrot.slane %v554_v12, %v2170_v35  ;;  %v584_v25 = vrot.slane %v570_v17, %v2170_v35 }
 0x22e   : > { %v373_v26 = vrot.slane %v366_v18, %v2168_v28  ;;  %v381_v27 = vrot.slane %v1638_v19, %v2168_v28  ;;  %v389_v29 = vrot.slane %v382_v20, %v2168_v28  ;;  %v397_v30 = vrot.slane %v1639_v21, %v2168_v28 }
 0x22f   : > { %v585_v31 = vcombine.low %v561_v22, %v577_v23  ;;  %v587_v32 = vcombine.low %v568_v24, %v584_v25  ;;  %v586_v44 = vcombine.high %v561_v22, %v577_v23  ;;  %v588_v46 = vcombine.high %v568_v24, %v584_v25 }
 0x230   : > { %v399_v33 = vcombine.high %v373_v26, %v381_v27  ;;  %v415_v34 = vcombine.high %v389_v29, %v397_v30  ;;  %v398_v36 = vcombine.low %v373_v26, %v381_v27  ;;  %v414_v37 = vcombine.low %v389_v29, %v397_v30 }
 0x231   : > { %1695 = vmatpush3.xpose.msk.msra.mxu1 %vm737_vm2, %v585_v31  ;;  %1705 = vmatpush3.xpose.msk.msra.mxu0 %vm737_vm2, %v587_v32 }
 0x232   : > { %1699 = vmatprep.subr.mxu1 %v1964_v1  ;;  %v406_v38 = vrot.slane %v398_v36, %v2170_v35  ;;  %v422_v39 = vrot.slane %v414_v37, %v2170_v35  ;;  %v413_v40 = vrot.slane %v399_v33, %v2170_v35  ;;  %v429_v41 = vrot.slane %v415_v34, %v2170_v35 }
 0x233   : > { %1714 = vmatprep.subr.mxu0 %v1964_v1 }
 0x234   : > { %v430_v42 = vcombine.low %v406_v38, %v422_v39  ;;  %v432_v43 = vcombine.low %v413_v40, %v429_v41  ;;  %v431_v45 = vcombine.high %v406_v38, %v422_v39  ;;  %v433_v47 = vcombine.high %v413_v40, %v429_v41 }
 0x236   : > { %1697 = vmatmul.mubr.msk.f32.vlgmr.msra.gmra.mrb[0].mxu1 %vm737_vm2, %v430_v42  ;;  %1707 = vmatmul.mubr.msk.f32.vlgmr.msra.gmra.mrb[2].mxu0 %vm737_vm2, %v432_v43 }
 0x237   : > { %1700 = vmatpush3.xpose.msk.msra.mxu1 %vm737_vm2, %v586_v44  ;;  %1701 = vmatprep.mubr.msk.f32.mxu1 %vm1963_vm0, %v1964_v1 }
 0x238   : > { %1709 = vmatprep.subr.mxu1 %v1964_v1  ;;  %1716 = vmatprep.mubr.msk.f32.mxu0 %vm1963_vm0, %v1964_v1 }
 0x23a   : > { %1702 = vmatmul.mubr.msk.f32.vlgmr.msra.gmra.mrb[2].mxu1 %vm737_vm2, %v431_v45 }
 0x23b   : > { %1710 = vmatpush3.xpose.msk.msra.mxu1 %vm737_vm2, %v588_v46  ;;  %1711 = vmatprep.mubr.msk.f32.mxu1 %vm1963_vm0, %v1964_v1 }
 0x23c   : > { %1719 = vmatprep.subr.mxu1 %v1964_v1 }
 0x23e   : > { %1712 = vmatmul.mubr.msk.f32.vlgmr.msra.gmra.mrb[4].mxu1 %vm737_vm2, %v433_v47 }
 0x23f   : > { %1721 = vmatprep.mubr.msk.f32.mxu1 %vm1963_vm0, %v1964_v1 }
 0x309   : > { %v810_v48 = vpop.f32.mrb[0].mxu1  ;;  %v962_v49 = vpop.f32.mrb[2].mxu0 }
 0x30a   : > { %v1698_v50 = vpop.f32.mrb[1].mxu1  ;;  %v1708_v51 = vpop.f32.mrb[3].mxu0  ;;  %v1042_v52 = vsel %vm737_vm2, %v810_v48, -inf  ;;  %v1048_v56 = vsel %vm737_vm2, %v962_v49, -inf }
 0x30b   : > { %1043 = vmax.xlane.f32.xlu0 %v1042_v52 }
 0x30d   : > { %v886_v53 = vpop.f32.mrb[2].mxu1 }
 0x30e   : > { %v1703_v54 = vpop.f32.mrb[3].mxu1  ;;  %v1045_v55 = vsel %vm737_vm2, %v886_v53, -inf }
 0x30f   : > { %1046 = vmax.xlane.f32.xlu1 %v1045_v55  ;;  %1049 = vmax.xlane.f32.xlu0 %v1048_v56 }
 0x311   : > { %v1038_v57 = vpop.f32.mrb[4].mxu1 }
 0x312   : > { %v1713_v58 = vpop.f32.mrb[5].mxu1  ;;  %v1051_v59 = vsel %vm737_vm2, %v1038_v57, -inf }
 0x313   : > { %1052 = vmax.xlane.f32.xlu0 %v1051_v59 }
 0x320   : > { %593 = vrot.lane.b32.xlu1 %v2163_v16, %s1969_s8 }
 0x324   : > { %595 = vrot.lane.b32.xlu1 %v2161_v15, %s1969_s8 }
 0x329   : > { %591 = vrot.lane.b32.xlu0 %v2158_v14, %s1969_s8 }
 0x398   : > { %v1044_v61 = vpop.xlane.xlu0 %1043 }
 0x399   : > { %v1054_v62 = vsub.f32 %v810_v48, %v1044_v61 }
 0x39b   : > { %v1058_v63 = vmul.f32 1.442695, %v1054_v62 }
 0x39c   : > { %v1047_v0 = vpop.xlane.xlu1 %1046  ;;  %v1050_v2 = vpop.xlane.xlu0 %1049 }
 0x39d   : > { %1812 = vpow2.f32 %v1058_v63  ;;  %v1055_v3 = vsub.f32 %v886_v53, %v1047_v0  ;;  %v1056_v4 = vsub.f32 %v962_v49, %v1050_v2 }
 0x39f   : > { %v1060_v5 = vmul.f32 1.442695, %v1055_v3  ;;  %v1062_v6 = vmul.f32 1.442695, %v1056_v4 }
 0x3a0   : > { %v594_v7 = vpop.permute.xlu1 %593  ;;  %v1053_v8 = vpop.xlane.xlu0 %1052 }
 0x3a1   : > { %1814 = vpow2.f32 %v1060_v5  ;;  %v1057_v16 = vsub.f32 %v1038_v57, %v1053_v8  ;;  %v601_v15 = vcombine.low %v590_v60, %v594_v7  ;;  %v602_v9 = vcombine.high %v590_v60, %v594_v7 }
 0x3a2   : > { %1816 = vpow2.f32 %v1062_v6 }
 0x3a3   : > { %v1064_v10 = vmul.f32 1.442695, %v1057_v16  ;;  %v609_v18 = vrot.slane %v601_v15, %v2168_v28  ;;  %v616_v19 = vrot.slane %v602_v9, %v2168_v28 }
 0x3a4   : > { %v596_v14 = vpop.permute.xlu1 %595  ;;  %v592_v11 = vpop.permute.xlu0 %591 }
 0x3a5   : > { %1818 = vpow2.f32 %v1064_v10  ;;  %v617_v12 = vcombine.low %v592_v11, %v596_v14  ;;  %v618_v13 = vcombine.high %v592_v11, %v596_v14 }
 0x3a7   : > { %v1813_v17 = vpop.eup %1812  ;;  %v625_v20 = vrot.slane %v617_v12, %v2168_v28  ;;  %v632_v21 = vrot.slane %v618_v13, %v2168_v28 }
 0x3a8   : > { %v1066_v22 = vsel %vm737_vm2, %v1813_v17, 0.0 }
 0x3a9   : > { %v633_v23 = vcombine.low %v609_v18, %v625_v20  ;;  %v634_v24 = vcombine.high %v609_v18, %v625_v20  ;;  %v649_v25 = vcombine.low %v616_v19, %v632_v21  ;;  %v650_v26 = vcombine.high %v616_v19, %v632_v21  ;;  %1067 = vadd.xlane.f32.xlu0 %v1066_v22 }
 0x3ab   : > { %v1815_v27 = vpop.eup %1814  ;;  %v641_v29 = vrot.slane %v633_v23, %v2170_v35  ;;  %v648_v30 = vrot.slane %v634_v24, %v2170_v35  ;;  %v657_v31 = vrot.slane %v649_v25, %v2170_v35  ;;  %v664_v32 = vrot.slane %v650_v26, %v2170_v35 }
 0x3ac   : > { %v1817_v33 = vpop.eup %1816  ;;  %v1069_v34 = vsel %vm737_vm2, %v1815_v27, 0.0 }
 0x3ad   : > { %v669_v36 = vcombine.low %v641_v29, %v648_v30  ;;  %v1642_v37 = vcombine.high %v641_v29, %v648_v30  ;;  %v685_v38 = vcombine.low %v657_v31, %v664_v32  ;;  %v1643_v39 = vcombine.high %v657_v31, %v664_v32  ;;  %1070 = vadd.xlane.f32.xlu1 %v1069_v34 }
 0x3ae   : > { %v1072_v40 = vsel %vm737_vm2, %v1817_v33, 0.0 }
 0x3af   : > { %v1819_v41 = vpop.eup %1818  ;;  %v676_v42 = vrot.slane %v669_v36, %v2168_v28  ;;  %v684_v43 = vrot.slane %v1642_v37, %v2168_v28  ;;  %v692_v44 = vrot.slane %v685_v38, %v2168_v28  ;;  %v700_v45 = vrot.slane %v1643_v39, %v2168_v28  ;;  %1073 = vadd.xlane.f32.xlu0 %v1072_v40 }
 0x3b0   : > { %v1075_v46 = vsel %vm737_vm2, %v1819_v41, 0.0 }
 0x3b1   : > { %v701_v47 = vcombine.low %v676_v42, %v684_v43  ;;  %v717_v48 = vcombine.low %v692_v44, %v700_v45  ;;  %v702_v49 = vcombine.high %v676_v42, %v684_v43  ;;  %v718_v50 = vcombine.high %v692_v44, %v700_v45 }
 0x3b3   : > { %1076 = vadd.xlane.f32.xlu0 %v1075_v46  ;;  %v709_v51 = vrot.slane %v701_v47, %v2170_v35  ;;  %v725_v52 = vrot.slane %v717_v48, %v2170_v35  ;;  %v716_v53 = vrot.slane %v702_v49, %v2170_v35  ;;  %v732_v54 = vrot.slane %v718_v50, %v2170_v35 }
 0x3b5   : > { %v733_v55 = vcombine.low %v709_v51, %v725_v52  ;;  %v734_v56 = vcombine.high %v709_v51, %v725_v52  ;;  %v735_v57 = vcombine.low %v716_v53, %v732_v54  ;;  %v736_v58 = vcombine.high %v716_v53, %v732_v54 }
 0x3b7   : > { %1715 = vmatpush3.msra.mxu0 %v733_v55  ;;  %1720 = vmatpush3.msra.mxu1 %v734_v56 }
 0x3b8   : > { %1717 = vmatmul.mubr.msk.f32.vlgmr.msra.gmra.mrb[4].mxu0 %vm737_vm2, %v1813_v17  ;;  %1722 = vmatmul.mubr.msk.f32.vlgmr.msra.gmra.mrb[6].mxu1 %vm737_vm2, %v1815_v27 }
 0x3b9   : > { %1724 = vmatprep.subr.mxu0 %v1964_v1  ;;  %1729 = vmatprep.subr.mxu1 %v1964_v1 }
 0x3ba   : > { %1725 = vmatpush3.msra.mxu0 %v735_v57  ;;  %1730 = vmatpush3.msra.mxu1 %v736_v58 }
 0x3bb   : > { %1726 = vmatprep.mubr.msk.f32.mxu0 %vm1963_vm0, %v1964_v1  ;;  %1731 = vmatprep.mubr.msk.f32.mxu1 %vm1963_vm0, %v1964_v1 }
 0x3bc   : > { %1727 = vmatmul.mubr.msk.f32.vlgmr.msra.gmra.mrb[6].mxu0 %vm737_vm2, %v1817_v33  ;;  %1732 = vmatmul.mubr.msk.f32.vlgmr.msra.gmra.mrb[8].mxu1 %vm737_vm2, %v1819_v41 }
 0x436   : > { %v1068_v59 = vpop.xlane.xlu0 %1067 }
 0x437   : > { %1820 = vrcp.f32 %v1068_v59 }
 0x43a   : > { %v1071_v61 = vpop.xlane.xlu1 %1070 }
 0x43b   : > { %1822 = vrcp.f32 %v1071_v61 }
 0x43c   : > { %v1074_v60 = vpop.xlane.xlu0 %1073 }
 0x43d   : > { %1824 = vrcp.f32 %v1074_v60 }
 0x440   : > { %v1077_v62 = vpop.xlane.xlu0 %1076 }
 0x441   : > { %1826 = vrcp.f32 %v1077_v62  ;;  %v1821_v2 = vpop.eup %1820 }
 0x445   : > { %v1823_v5 = vpop.eup %1822 }
 0x447   : > { %v1825_v6 = vpop.eup %1824 }
 0x44b   : > { %v1827_v1 = vpop.eup %1826 }
 0x48b   : > { %v1147_v63 = vpop.f32.mrb[4].mxu0  ;;  %v1220_v0 = vpop.f32.mrb[6].mxu1 }
 0x48c   : > { %v1718_v3 = vpop.f32.mrb[5].mxu0  ;;  %v1723_v4 = vpop.f32.mrb[7].mxu1  ;;  %v1374_v16 = vmul.f32 %v1821_v2, %v1147_v63  ;;  %v1375_v15 = vmul.f32 %v1823_v5, %v1220_v0 }
 0x48f   : > { %v1293_v7 = vpop.f32.mrb[6].mxu0  ;;  %v1366_v8 = vpop.f32.mrb[8].mxu1 }
 0x490   : > { %v1376_v9 = vmul.f32 %v1825_v6, %v1293_v7  ;;  %v1377_v10 = vmul.f32 %v1827_v1, %v1366_v8  ;;  %v1728_v14 = vpop.f32.mrb[7].mxu0  ;;  %v1733_v11 = vpop.f32.mrb[9].mxu1 }
 0x492   : > { %v1378_v12 = vcombine.low %v1374_v16, %v1376_v9  ;;  %v1379_v13 = vcombine.high %v1374_v16, %v1376_v9  ;;  %v1394_v17 = vcombine.low %v1375_v15, %v1377_v10  ;;  %v1395_v18 = vcombine.high %v1375_v15, %v1377_v10 }
 0x494   : > { %v1386_v19 = vrot.slane %v1378_v12, %v2168_v28  ;;  %v1393_v20 = vrot.slane %v1379_v13, %v2168_v28  ;;  %v1402_v21 = vrot.slane %v1394_v17, %v2168_v28  ;;  %v1409_v22 = vrot.slane %v1395_v18, %v2168_v28 }
 0x496   : > { %v1410_v23 = vcombine.low %v1386_v19, %v1402_v21  ;;  %v1411_v24 = vcombine.high %v1386_v19, %v1402_v21  ;;  %v1426_v25 = vcombine.low %v1393_v20, %v1409_v22  ;;  %v1427_v26 = vcombine.high %v1393_v20, %v1409_v22 }
 0x498   : > { %v1418_v27 = vrot.slane %v1410_v23, %v2170_v35  ;;  %v1425_v29 = vrot.slane %v1411_v24, %v2170_v35  ;;  %v1434_v30 = vrot.slane %v1426_v25, %v2170_v35  ;;  %v1441_v31 = vrot.slane %v1427_v26, %v2170_v35 }
 0x49a   : > { %v1446_v32 = vcombine.low %v1418_v27, %v1425_v29  ;;  %v1656_v33 = vcombine.high %v1418_v27, %v1425_v29  ;;  %v1462_v34 = vcombine.low %v1434_v30, %v1441_v31  ;;  %v1657_v36 = vcombine.high %v1434_v30, %v1441_v31 }
 0x49c   : > { %v1453_v37 = vrot.slane %v1446_v32, %v2168_v28  ;;  %v1461_v38 = vrot.slane %v1656_v33, %v2168_v28  ;;  %v1469_v39 = vrot.slane %v1462_v34, %v2168_v28  ;;  %v1477_v40 = vrot.slane %v1657_v36, %v2168_v28 }
 0x49e   : > { %v1479_v41 = vcombine.high %v1453_v37, %v1461_v38  ;;  %v1495_v42 = vcombine.high %v1469_v39, %v1477_v40  ;;  %v1478_v43 = vcombine.low %v1453_v37, %v1461_v38  ;;  %v1494_v44 = vcombine.low %v1469_v39, %v1477_v40 }
 0x4a0   : > { %v1493_v45 = vrot.slane %v1479_v41, %v2170_v35  ;;  %v1509_v46 = vrot.slane %v1495_v42, %v2170_v35  ;;  %v1486_v47 = vrot.slane %v1478_v43, %v2170_v35  ;;  %v1502_v48 = vrot.slane %v1494_v44, %v2170_v35 }
 0x4a2   : > { %v1512_v49 = vcombine.low %v1493_v45, %v1509_v46  ;;  %v1511_v50 = vcombine.high %v1486_v47, %v1502_v48  ;;  %v1513_v51 = vcombine.high %v1493_v45, %v1509_v46  ;;  %v1510_v52 = vcombine.low %v1486_v47, %v1502_v48 }
 0x4a4   : > { %1519 = vrot.lane.b32.xlu0 %v1512_v49, %s1972_s9  ;;  %1515 = vrot.lane.b32.xlu1 %v1511_v50, %s1973_s10 }
 0x4a8   : > { %1523 = vrot.lane.b32.xlu1 %v1513_v51, %s1974_s11 }
 0x516   : > { %v1516_v28 = vpop.permute.xlu1 %1515  ;;  %v1520_v53 = vpop.permute.xlu0 %1519 }
 0x517   : > { %v1526_v54 = vsel %vm737_vm2, %v1510_v52, %v1516_v28 }
 0x518   : > { %v1528_v55 = vsel %vm1527_vm3, %v1526_v54, %v1520_v53 }
 0x51a   : > { %v1524_v35 = vpop.permute.xlu1 %1523 }
 0x51b   : > { %v1530_v56 = vsel %vm1529_vm4, %v1528_v55, %v1524_v35 }
 0x51c   : > { %1531 = vst.msk [vmem:[%s200_s28] sm:$0xff] %vm213_vm1, %v1530_v56 }
 0x51d   : > { %1899 = shalt.err (!%p1896_p7)
}
 0x51e   : > { %s1900_s30 = scalar_lea.hbm %s2287_s7, 128  ;;  %s1904_s5 = scalar_lea.hbm %s2335_s3, 256 }
 0x51f   : > { %p1901_p9 = scmp.ne.s32.totalorder %s2287_s7, %s1900_s30  ;;  %p1905_p0 = scmp.lt.u32.totalorder %s2287_s7, %s2335_s3 }
 0x520   : > { %p1906_p11 = scmp.lt.u32.totalorder %s1904_s5, %s1900_s30  ;;  %p1908_p4 = scmp.lt.u32.totalorder %s1900_s30, %s2287_s7 }
 0x521   : > { %p1902_p2 = pnand %p1901_p9, %p2087_p12 }
 0x522   : > { %p1907_p1 = por %p1906_p11, %p1905_p0 }
 0x523   : > { %p1903_p5 = pneg %p1902_p2 }
 0x524   : > { %p1909_p6 = por %p1908_p4, %p1907_p1 }
 0x526   : > { %p1910_p8 = pnand %p1909_p6, %p1903_p5 }
 0x528   : > { %1913 = shalt.err (!%p1910_p8)
}
 0x529   : > { %1746 = dma.vmem_to_hbm [thread:$0]  (%p2087_p12), %s2289_s29, 128, %s2287_s7, %s1533_s16  }
 0x52a PF: > { %s1558_s10 = sand.u32 1, %s1944_s12   ;;  %p2350_p10 = scmp.ne.s32.totalorder %s2340_s19, 0 }
 0x52b   : > { %p2351_p13 = scmp.ge.s32.totalorder %s1956_s15, 2  ;;  %s1559_s11 = scalar_lea.sflag [#allocation4], %s1558_s10 }
 0x52d   : > { %p1757_p3 = pnand %p2351_p13, %p2350_p10 }
 0x52f   : > { %1939 = dma.done.wait (!%p1757_p3), %s1559_s11, 128  }
 0x530   : > { %1941 = vsyncadd (!%p1757_p3), %s1559_s11, 4294967168  ;;  %p17_p7 = scmp.ge.s32.totalorder %s2052_s24, 4   ;;  %s2352_s12 = smov %s1948_s13 }
 0x531   : > { %s2353_s13 = smov %s1952_s14  ;;  %s2354_s14 = smov %s2083_s17 }
 0x532   : > { %s2355_s15 = smov %s2052_s24  ;;  %19 = sbr.rel (!%p17_p7) target bundleno = 6 (0x6), region = 81 }
 0x539   :  { %1564 = vsyncpa [#allocation3], 1 }
 0x53a   :  { %1566 = vsyncpa [#allocation3 + $0x1], 1 }
 0x53b   :  { %1567 = vsyncpa [#allocation6], 1 }
 0x53c   :  { %1568 = vsyncpa [#allocation4], 1 }
 0x53d   :  { %1570 = vsyncpa [#allocation4 + $0x1], 1 }

</bundles_post_ra>
